<compile_context>
chip_gen: v7x
topology: tpu7x:2x2x1
jax: 0.10.0
libtpu: 0.0.40
codegen_flags: <defaults>
</compile_context>

<pallas_src>
import functools

import jax
import jax.numpy as jnp
from jax.experimental import pallas as pl
from jax.experimental.pallas import tpu as pltpu


# ----------------------------- Pallas kernel ------------------------------- #
def global_model_kernel(
    ea_ref,      # (TE, F_edge)   edge-attr tile (bf16)
    row_ref,     # (TE, 1)        source-node id per edge (int32)
    ge_ref,      # (1, TE)        graph id of each edge's destination (-1 = pad)
    x_ref,       # (N, F_node)    node features (bf16, full-resident)
    batch_ref,   # (1, N)         graph id per node (int32)
    w1x_ref,     # (F_node, Hp)   collapsed mlp1 weight, node part (bf16)
    w1e_ref,     # (F_edge, Hp)   collapsed mlp1 weight, edge part (bf16)
    b1_ref,      # (1, Hp)        collapsed mlp1 bias (f32)
    w2x_ref,     # (F_node, Fgp)  collapsed mlp2 weight, node-sum part (f32)
    w2a_ref,     # (Hp, Fgp)      collapsed mlp2 weight, edge-agg part (f32)
    b2_ref,      # (1, Fgp)       collapsed mlp2 bias (f32)
    out_ref,     # (B, Fgp)       output (f32), written on last tile
    acc_ref,     # (B, Hp)  f32   per-graph edge aggregate accumulator
    xw_ref,      # (N, Hp)  mxu   x @ W1x, computed once on tile 0
):
    i = pl.program_id(0)
    te = ea_ref.shape[0]
    n = x_ref.shape[0]
    b = acc_ref.shape[0]
    mm_dtype = xw_ref.dtype

    @pl.when(i == 0)
    def _init():
        acc_ref[...] = jnp.zeros_like(acc_ref)
        # Fold the gather through the first collapsed weight (done once).
        xw_ref[...] = jnp.dot(
            x_ref[...], w1x_ref[...], preferred_element_type=jnp.float32
        ).astype(mm_dtype)

    # ---------------- per-edge-tile work (collapsed global_mlp_1) -----------
    row = row_ref[...]                                   # (TE, 1)
    ge = ge_ref[...]                                     # (1, TE)

    # Gather x[row] @ W1x as one-hot @ xw (one-hot is exact in bf16).
    row_oh = (jax.lax.broadcasted_iota(jnp.int32, (te, n), 1) == row
              ).astype(mm_dtype)                         # (TE, N)
    x_side = jnp.dot(row_oh, xw_ref[...], preferred_element_type=jnp.float32)
    e_side = jnp.dot(ea_ref[...], w1e_ref[...], preferred_element_type=jnp.float32)
    h = x_side + e_side + b1_ref[...]                    # (TE, Hp)

    # scatter_add over col then over batch == scatter_add over batch[col];
    # one-hot built already transposed (B, TE) so the MXU is fed directly.
    g_oh_t = (jax.lax.broadcasted_iota(jnp.int32, (b, te), 0) == ge
              ).astype(mm_dtype)                         # (B, TE)
    acc_ref[...] += jnp.dot(g_oh_t, h.astype(mm_dtype),
                            preferred_element_type=jnp.float32)

    # ---------------- finalize: node readout + collapsed global_mlp_2 -------
    @pl.when(i == pl.num_programs(0) - 1)
    def _finalize():
        b_oh_t = (jax.lax.broadcasted_iota(jnp.int32, (b, n), 0) == batch_ref[...]
                  ).astype(mm_dtype)                     # (B, N)
        x_sum = jnp.dot(b_oh_t, x_ref[...], preferred_element_type=jnp.float32)
        out_ref[...] = (
            jnp.dot(x_sum, w2x_ref[...], preferred_element_type=jnp.float32)
            + jnp.dot(acc_ref[...], w2a_ref[...], preferred_element_type=jnp.float32)
            + b2_ref[...]
        )


# ------------------------------ Wrapper ------------------------------------ #
def _round_up(v, m):
    return ((v + m - 1) // m) * m


def _collapse_affine(weights, biases):
    """Collapse a bias-only linear stack: valid because activation/norm=None."""
    w, b = weights[0], biases[0]
    for wi, bi in zip(weights[1:], biases[1:]):
        w = w @ wi
        b = b @ wi + bi
    return w, b


def global_model_forward(x, edge_index, edge_attr, u, batch, params,
                         num_graphs=None, edge_tile=128,
                         mxu_dtype=jnp.bfloat16):
    # u is unused by GlobalModel.forward (kept for signature parity).
    del u
    assert edge_tile % 128 == 0
    N, F_node = x.shape
    E, F_edge = edge_attr.shape
    if num_graphs is None:
        num_graphs = int(jax.device_get(jnp.max(batch))) + 1
    B = num_graphs
    H = params["w11"].shape[0]
    Fg = params["w22"].shape[1]

    # -- collapse both activation-free MLPs into single affine maps (exact) --
    W1, b1 = _collapse_affine([params["w10"], params["w11"], params["w12"]],
                              [params["b10"], params["b11"], params["b12"]])
    W2, b2 = _collapse_affine([params["w20"], params["w21"], params["w22"]],
                              [params["b20"], params["b21"], params["b22"]])
    w1x, w1e = W1[:F_node], W1[F_node:]        # cat([x[row], edge_attr]) order
    w2x, w2a = W2[:F_node], W2[F_node:]        # cat([x_sum, agg_sum]) order

    # -- pad feature dims to 128-lane multiples (zeros; sliced off at the end)
    Hp = _round_up(H, 128)                     # prefer 256 on v6e for full MXU
    Fgp = _round_up(Fg, 128)
    pad_c = lambda a, c: jnp.pad(a, ((0, 0), (0, c - a.shape[1])))
    w1x_p = pad_c(w1x, Hp).astype(mxu_dtype)
    w1e_p = pad_c(w1e, Hp).astype(mxu_dtype)
    b1_p = pad_c(b1, Hp).astype(jnp.float32)
    w2x_p = pad_c(w2x, Fgp).astype(jnp.float32)
    w2a_p = jnp.pad(w2a, ((0, Hp - H), (0, Fgp - Fg))).astype(jnp.float32)
    b2_p = pad_c(b2, Fgp).astype(jnp.float32)

    # -- edge-side index preprocessing (tiny O(E) int work, done in XLA) -----
    row = edge_index[0].astype(jnp.int32)
    col = edge_index[1].astype(jnp.int32)
    ge = batch.astype(jnp.int32)[col]          # graph of each edge's destination
    E_pad = _round_up(max(E, 1), edge_tile)
    pad_e = E_pad - E
    ea_p = jnp.pad(edge_attr.astype(jnp.float32),
                   ((0, pad_e), (0, 0))).astype(mxu_dtype)
    row_p = jnp.pad(row, (0, pad_e)).reshape(E_pad, 1)
    ge_p = jnp.pad(ge, (0, pad_e), constant_values=-1).reshape(1, E_pad)

    x_mx = x.astype(mxu_dtype)
    batch_row = batch.astype(jnp.int32).reshape(1, N)

    operands = (ea_p, row_p, ge_p, x_mx, batch_row,
                w1x_p, w1e_p, b1_p, w2x_p, w2a_p, b2_p)

    grid = (E_pad // edge_tile,)
    full = lambda shape: pl.BlockSpec(shape, lambda i: (0,) * len(shape))

    flops = int(2 * N * F_node * Hp
                + 2 * E_pad * Hp * (N + F_edge + B)
                + 2 * B * (N * F_node + F_node * Fgp + Hp * Fgp))
    bytes_accessed = int(sum(int(a.size) * a.dtype.itemsize for a in operands)
                         + B * Fgp * 4)

    out = pl.pallas_call(
        global_model_kernel,
        out_shape=jax.ShapeDtypeStruct((B, Fgp), jnp.float32),
        grid_spec=pltpu.PrefetchScalarGridSpec(
            num_scalar_prefetch=0,
            grid=grid,
            in_specs=[
                pl.BlockSpec((edge_tile, F_edge), lambda i: (i, 0)),  # edge_attr
                pl.BlockSpec((edge_tile, 1), lambda i: (i, 0)),       # row ids
                pl.BlockSpec((1, edge_tile), lambda i: (0, i)),       # graph-of-edge
                full((N, F_node)), full((1, N)),
                full((F_node, Hp)), full((F_edge, Hp)), full((1, Hp)),
                full((F_node, Fgp)), full((Hp, Fgp)), full((1, Fgp)),
            ],
            out_specs=pl.BlockSpec((B, Fgp), lambda i: (0, 0)),
            scratch_shapes=[pltpu.VMEM((B, Hp), jnp.float32),
                            pltpu.VMEM((N, Hp), mxu_dtype)],
        ),
        compiler_params=pltpu.CompilerParams(
            dimension_semantics=("arbitrary",)),   # edge axis is a reduction
        cost_estimate=pl.CostEstimate(flops=flops, transcendentals=0,
                                      bytes_accessed=bytes_accessed),
    )(*operands)
    return out[:, :Fg]


# ------------------------- Deterministic parameters ------------------------ #
def xavier_normal(key, fan_in, fan_out):
    std = (2.0 / (fan_in + fan_out)) ** 0.5
    return jax.random.normal(key, (fan_in, fan_out), dtype=jnp.float32) * std


def init_global_model_params(key, num_edge_feats, num_node_feats,
                             num_global_feats, size_hid_layers):
    # num_hid_layers = 2, activation/norm = None (module defaults used here).
    H = size_hid_layers
    in1 = num_edge_feats + num_node_feats
    in2 = H + num_node_feats
    ks = jax.random.split(key, 6)
    bias = lambda n: jnp.full((1, n), 0.01, dtype=jnp.float32)
    return {
        # global_mlp_1: Lin0(in1,H), Lin1(H,H), Lin2(H,H)
        "w10": xavier_normal(ks[0], in1, H), "b10": bias(H),
        "w11": xavier_normal(ks[1], H, H), "b11": bias(H),
        "w12": xavier_normal(ks[2], H, H), "b12": bias(H),
        # global_mlp_2: Lin0(in2,H), Lin1(H,H), Lin2(H,Fg)
        # (first num_node_feats rows of w20 act on scatter(x,batch), rest on agg)
        "w20": xavier_normal(ks[3], in2, H), "b20": bias(H),
        "w21": xavier_normal(ks[4], H, H), "b21": bias(H),
        "w22": xavier_normal(ks[5], H, num_global_feats),
        "b22": bias(num_global_feats),
    }


# ------------------------- Pure-JAX reference ------------------------------ #
def global_model_reference(x, edge_index, edge_attr, u, batch, params,
                           num_graphs):
    del u
    row, col = edge_index[0], edge_index[1]
    N = x.shape[0]
    h = jnp.concatenate([x[row], edge_attr], axis=1)
    h = h @ params["w10"] + params["b10"]
    h = h @ params["w11"] + params["b11"]
    h = h @ params["w12"] + params["b12"]
    node_agg = jax.ops.segment_sum(h, col, num_segments=N)
    x_sum = jax.ops.segment_sum(x, batch, num_segments=num_graphs)
    agg_sum = jax.ops.segment_sum(node_agg, batch, num_segments=num_graphs)
    g = jnp.concatenate([x_sum, agg_sum], axis=1)
    g = g @ params["w20"] + params["b20"]
    g = g @ params["w21"] + params["b21"]
    return g @ params["w22"] + params["b22"]


if __name__ == "__main__":
    num_node_feats = 4
    num_edge_feats = 3
    num_global_feats = 2
    size_hid_layers = 32
    N_nodes = 32
    N_edges = 300          # -> 3 edge tiles of 128 after padding
    N_graphs = 3

    key = jax.random.PRNGKey(0)
    k_x, k_ea, k_ei, k_p = jax.random.split(key, 4)

    x = jax.random.normal(k_x, (N_nodes, num_node_feats), dtype=jnp.float32)
    edge_attr = jax.random.normal(k_ea, (N_edges, num_edge_feats),
                                  dtype=jnp.float32)
    edge_index = jax.random.randint(k_ei, (2, N_edges), 0, N_nodes,
                                    dtype=jnp.int32)
    batch = (jnp.arange(N_nodes, dtype=jnp.int32) * N_graphs) // N_nodes
    u = jnp.zeros((N_graphs, num_global_feats), dtype=jnp.float32)  # unused

    params = init_global_model_params(k_p, num_edge_feats, num_node_feats,
                                      num_global_feats, size_hid_layers)

    out = global_model_forward(x, edge_index, edge_attr, u, batch, params,
                               num_graphs=N_graphs)
    out = jax.block_until_ready(out)

    ref = global_model_reference(x, edge_index, edge_attr, u, batch, params,
                                 N_graphs)
    assert out.shape == (N_graphs, num_global_feats)
    # bf16 MXU operands -> small expected drift; check error relative to scale.
    max_err = float(jnp.max(jnp.abs(out - ref)))
    tol = 2e-2 * float(jnp.max(jnp.abs(ref))) + 1e-3
    assert max_err < tol, (max_err, tol)

    print("KERNEL_OK")
</pallas_src>

<mosaic_0001>
module attributes {stable_mosaic.version = 11 : i64} {
  func.func @global_model_kernel(%arg0: i32, %arg1: memref<128x3xbf16, #tpu.memory_space<vmem>>, %arg2: memref<128x1xi32, #tpu.memory_space<vmem>>, %arg3: memref<1x128xi32, #tpu.memory_space<vmem>>, %arg4: memref<32x4xbf16, #tpu.memory_space<vmem>>, %arg5: memref<1x32xi32, #tpu.memory_space<vmem>>, %arg6: memref<4x128xbf16, #tpu.memory_space<vmem>>, %arg7: memref<3x128xbf16, #tpu.memory_space<vmem>>, %arg8: memref<1x128xf32, #tpu.memory_space<vmem>>, %arg9: memref<4x128xf32, #tpu.memory_space<vmem>>, %arg10: memref<128x128xf32, #tpu.memory_space<vmem>>, %arg11: memref<1x128xf32, #tpu.memory_space<vmem>>, %arg12: memref<3x128xf32, #tpu.memory_space<vmem>>, %arg13: memref<3x128xf32, #tpu.memory_space<vmem>>, %arg14: memref<32x128xbf16, #tpu.memory_space<vmem>>) attributes {dimension_semantics = [#tpu.dimension_semantics<arbitrary>], iteration_bounds = array<i64: 3>, scalar_prefetch = 0 : i64, scratch_operands = 2 : i64, tpu.core_type = #tpu.core_type<tc>, window_params = [{transform_indices = @transform_0, window_bounds = array<i64: 128, 3>}, {transform_indices = @transform_1, window_bounds = array<i64: 128, 1>}, {transform_indices = @transform_2, window_bounds = array<i64: 1, 128>}, {pipeline_mode = #tpu.pipeline_mode<synchronous>, transform_indices = @transform_3, window_bounds = array<i64: 32, 4>}, {pipeline_mode = #tpu.pipeline_mode<synchronous>, transform_indices = @transform_4, window_bounds = array<i64: 1, 32>}, {pipeline_mode = #tpu.pipeline_mode<synchronous>, transform_indices = @transform_5, window_bounds = array<i64: 4, 128>}, {pipeline_mode = #tpu.pipeline_mode<synchronous>, transform_indices = @transform_6, window_bounds = array<i64: 3, 128>}, {pipeline_mode = #tpu.pipeline_mode<synchronous>, transform_indices = @transform_7, window_bounds = array<i64: 1, 128>}, {pipeline_mode = #tpu.pipeline_mode<synchronous>, transform_indices = @transform_8, window_bounds = array<i64: 4, 128>}, {pipeline_mode = #tpu.pipeline_mode<synchronous>, transform_indices = @transform_9, window_bounds = array<i64: 128, 128>}, {pipeline_mode = #tpu.pipeline_mode<synchronous>, transform_indices = @transform_10, window_bounds = array<i64: 1, 128>}, {pipeline_mode = #tpu.pipeline_mode<synchronous>, transform_indices = @transform_11, window_bounds = array<i64: 3, 128>}]} {
    %c0_i32 = arith.constant 0 : i32
    %0 = arith.cmpi eq, %arg0, %c0_i32 : i32
    %1 = arith.extui %0 : i1 to i32
    %c0_i32_0 = arith.constant 0 : i32
    %2 = arith.cmpi ne, %1, %c0_i32_0 : i32
    scf.if %2 {
      %cst_19 = arith.constant 0.000000e+00 : f32
      %34 = vector.broadcast %cst_19 : f32 to vector<3x128xf32>
      %c0_20 = arith.constant 0 : index
      %c0_21 = arith.constant 0 : index
      %35 = vector.load %arg13[%c0_20, %c0_21] : memref<3x128xf32, #tpu.memory_space<vmem>>, vector<3x128xf32>
      tpu.vector_store %arg13[%c0_20, %c0_21], %34 {strides = array<i32>} : memref<3x128xf32, #tpu.memory_space<vmem>>, vector<3x128xf32>,
      %c0_22 = arith.constant 0 : index
      %c0_23 = arith.constant 0 : index
      %36 = vector.load %arg4[%c0_22, %c0_23] : memref<32x4xbf16, #tpu.memory_space<vmem>>, vector<32x4xbf16>
      %c0_24 = arith.constant 0 : index
      %c0_25 = arith.constant 0 : index
      %37 = vector.load %arg6[%c0_24, %c0_25] : memref<4x128xbf16, #tpu.memory_space<vmem>>, vector<4x128xbf16>
      %cst_26 = arith.constant dense<0.000000e+00> : vector<32x128xf32>
      %38 = tpu.matmul %36, %37, %cst_26 {dimension_numbers = #tpu.dot_dimension_numbers<[1], [0], [0], [1], [0, 0, 1, 1], [], []>} : vector<32x4xbf16>, vector<4x128xbf16>, vector<32x128xf32> -> vector<32x128xf32>
      %39 = arith.truncf %38 : vector<32x128xf32> to vector<32x128xbf16>
      %c0_27 = arith.constant 0 : index
      %c0_28 = arith.constant 0 : index
      %40 = vector.load %arg14[%c0_27, %c0_28] : memref<32x128xbf16, #tpu.memory_space<vmem>>, vector<32x128xbf16>
      tpu.vector_store %arg14[%c0_27, %c0_28], %39 {strides = array<i32>} : memref<32x128xbf16, #tpu.memory_space<vmem>>, vector<32x128xbf16>,
    } else {
    }
    %c0 = arith.constant 0 : index
    %c0_1 = arith.constant 0 : index
    %3 = vector.load %arg2[%c0, %c0_1] : memref<128x1xi32, #tpu.memory_space<vmem>>, vector<128x1xi32>
    %c0_2 = arith.constant 0 : index
    %c0_3 = arith.constant 0 : index
    %4 = vector.load %arg3[%c0_2, %c0_3] : memref<1x128xi32, #tpu.memory_space<vmem>>, vector<1x128xi32>
    %5 = tpu.iota {dimensions = array<i32: 1>} : vector<128x32xi32>
    %6 = vector.broadcast %3 : vector<128x1xi32> to vector<128x32xi32>
    %7 = arith.cmpi eq, %5, %6 : vector<128x32xi32>
    %8 = arith.extui %7 : vector<128x32xi1> to vector<128x32xi32>
    %9 = arith.sitofp %8 : vector<128x32xi32> to vector<128x32xf32>
    %10 = arith.truncf %9 : vector<128x32xf32> to vector<128x32xbf16>
    %c0_4 = arith.constant 0 : index
    %c0_5 = arith.constant 0 : index
    %11 = vector.load %arg14[%c0_4, %c0_5] : memref<32x128xbf16, #tpu.memory_space<vmem>>, vector<32x128xbf16>
    %cst = arith.constant dense<0.000000e+00> : vector<128x128xf32>
    %12 = tpu.matmul %10, %11, %cst {dimension_numbers = #tpu.dot_dimension_numbers<[1], [0], [0], [1], [0, 0, 1, 1], [], []>} : vector<128x32xbf16>, vector<32x128xbf16>, vector<128x128xf32> -> vector<128x128xf32>
    %c0_6 = arith.constant 0 : index
    %c0_7 = arith.constant 0 : index
    %13 = vector.load %arg1[%c0_6, %c0_7] : memref<128x3xbf16, #tpu.memory_space<vmem>>, vector<128x3xbf16>
    %c0_8 = arith.constant 0 : index
    %c0_9 = arith.constant 0 : index
    %14 = vector.load %arg7[%c0_8, %c0_9] : memref<3x128xbf16, #tpu.memory_space<vmem>>, vector<3x128xbf16>
    %cst_10 = arith.constant dense<0.000000e+00> : vector<128x128xf32>
    %15 = tpu.matmul %13, %14, %cst_10 {dimension_numbers = #tpu.dot_dimension_numbers<[1], [0], [0], [1], [0, 0, 1, 1], [], []>} : vector<128x3xbf16>, vector<3x128xbf16>, vector<128x128xf32> -> vector<128x128xf32>
    %16 = arith.addf %12, %15 : vector<128x128xf32>
    %c0_11 = arith.constant 0 : index
    %c0_12 = arith.constant 0 : index
    %17 = vector.load %arg8[%c0_11, %c0_12] : memref<1x128xf32, #tpu.memory_space<vmem>>, vector<1x128xf32>
    %18 = vector.broadcast %17 : vector<1x128xf32> to vector<128x128xf32>
    %19 = arith.addf %16, %18 : vector<128x128xf32>
    %20 = tpu.iota {dimensions = array<i32: 0>} : vector<3x128xi32>
    %21 = vector.broadcast %4 : vector<1x128xi32> to vector<3x128xi32>
    %22 = arith.cmpi eq, %20, %21 : vector<3x128xi32>
    %23 = arith.extui %22 : vector<3x128xi1> to vector<3x128xi32>
    %24 = arith.sitofp %23 : vector<3x128xi32> to vector<3x128xf32>
    %25 = arith.truncf %24 : vector<3x128xf32> to vector<3x128xbf16>
    %c0_13 = arith.constant 0 : index
    %c0_14 = arith.constant 0 : index
    %26 = vector.load %arg13[%c0_13, %c0_14] : memref<3x128xf32, #tpu.memory_space<vmem>>, vector<3x128xf32>
    %27 = arith.truncf %19 : vector<128x128xf32> to vector<128x128xbf16>
    %cst_15 = arith.constant dense<0.000000e+00> : vector<3x128xf32>
    %28 = tpu.matmul %25, %27, %cst_15 {dimension_numbers = #tpu.dot_dimension_numbers<[1], [0], [0], [1], [0, 0, 1, 1], [], []>} : vector<3x128xbf16>, vector<128x128xbf16>, vector<3x128xf32> -> vector<3x128xf32>
    %29 = arith.addf %26, %28 : vector<3x128xf32>
    %c0_16 = arith.constant 0 : index
    %c0_17 = arith.constant 0 : index
    %30 = vector.load %arg13[%c0_16, %c0_17] : memref<3x128xf32, #tpu.memory_space<vmem>>, vector<3x128xf32>
    tpu.vector_store %arg13[%c0_16, %c0_17], %29 {strides = array<i32>} : memref<3x128xf32, #tpu.memory_space<vmem>>, vector<3x128xf32>,
    %c2_i32 = arith.constant 2 : i32
    %31 = arith.cmpi eq, %arg0, %c2_i32 : i32
    %32 = arith.extui %31 : i1 to i32
    %c0_i32_18 = arith.constant 0 : i32
    %33 = arith.cmpi ne, %32, %c0_i32_18 : i32
    scf.if %33 {
      %34 = tpu.iota {dimensions = array<i32: 0>} : vector<3x32xi32>
      %c0_19 = arith.constant 0 : index
      %c0_20 = arith.constant 0 : index
      %35 = vector.load %arg5[%c0_19, %c0_20] : memref<1x32xi32, #tpu.memory_space<vmem>>, vector<1x32xi32>
      %36 = vector.broadcast %35 : vector<1x32xi32> to vector<3x32xi32>
      %37 = arith.cmpi eq, %34, %36 : vector<3x32xi32>
      %38 = arith.extui %37 : vector<3x32xi1> to vector<3x32xi32>
      %39 = arith.sitofp %38 : vector<3x32xi32> to vector<3x32xf32>
      %40 = arith.truncf %39 : vector<3x32xf32> to vector<3x32xbf16>
      %c0_21 = arith.constant 0 : index
      %c0_22 = arith.constant 0 : index
      %41 = vector.load %arg4[%c0_21, %c0_22] : memref<32x4xbf16, #tpu.memory_space<vmem>>, vector<32x4xbf16>
      %cst_23 = arith.constant dense<0.000000e+00> : vector<3x4xf32>
      %42 = tpu.matmul %40, %41, %cst_23 {dimension_numbers = #tpu.dot_dimension_numbers<[1], [0], [0], [1], [0, 0, 1, 1], [], []>} : vector<3x32xbf16>, vector<32x4xbf16>, vector<3x4xf32> -> vector<3x4xf32>
      %c0_24 = arith.constant 0 : index
      %c0_25 = arith.constant 0 : index
      %43 = vector.load %arg9[%c0_24, %c0_25] : memref<4x128xf32, #tpu.memory_space<vmem>>, vector<4x128xf32>
      %cst_26 = arith.constant dense<0.000000e+00> : vector<3x128xf32>
      %44 = tpu.matmul %42, %43, %cst_26 {dimension_numbers = #tpu.dot_dimension_numbers<[1], [0], [0], [1], [0, 0, 1, 1], [], []>} : vector<3x4xf32>, vector<4x128xf32>, vector<3x128xf32> -> vector<3x128xf32>
      %c0_27 = arith.constant 0 : index
      %c0_28 = arith.constant 0 : index
      %45 = vector.load %arg13[%c0_27, %c0_28] : memref<3x128xf32, #tpu.memory_space<vmem>>, vector<3x128xf32>
      %c0_29 = arith.constant 0 : index
      %c0_30 = arith.constant 0 : index
      %46 = vector.load %arg10[%c0_29, %c0_30] : memref<128x128xf32, #tpu.memory_space<vmem>>, vector<128x128xf32>
      %cst_31 = arith.constant dense<0.000000e+00> : vector<3x128xf32>
      %47 = tpu.matmul %45, %46, %cst_31 {dimension_numbers = #tpu.dot_dimension_numbers<[1], [0], [0], [1], [0, 0, 1, 1], [], []>} : vector<3x128xf32>, vector<128x128xf32>, vector<3x128xf32> -> vector<3x128xf32>
      %48 = arith.addf %44, %47 : vector<3x128xf32>
      %c0_32 = arith.constant 0 : index
      %c0_33 = arith.constant 0 : index
      %49 = vector.load %arg11[%c0_32, %c0_33] : memref<1x128xf32, #tpu.memory_space<vmem>>, vector<1x128xf32>
      %50 = vector.broadcast %49 : vector<1x128xf32> to vector<3x128xf32>
      %51 = arith.addf %48, %50 : vector<3x128xf32>
      %c0_34 = arith.constant 0 : index
      %c0_35 = arith.constant 0 : index
      %52 = vector.load %arg12[%c0_34, %c0_35] : memref<3x128xf32, #tpu.memory_space<vmem>>, vector<3x128xf32>
      tpu.vector_store %arg12[%c0_34, %c0_35], %51 {strides = array<i32>} : memref<3x128xf32, #tpu.memory_space<vmem>>, vector<3x128xf32>,
    } else {
    }
    return
  }
  func.func @transform_0(%arg0: i32) -> (i32, i32) {
    %c0_i32 = arith.constant 0 : i32
    %c0_i32_0 = arith.constant 0 : i32
    return %arg0, %c0_i32 : i32, i32
  }
  func.func @transform_1(%arg0: i32) -> (i32, i32) {
    %c0_i32 = arith.constant 0 : i32
    %c0_i32_0 = arith.constant 0 : i32
    return %arg0, %c0_i32 : i32, i32
  }
  func.func @transform_2(%arg0: i32) -> (i32, i32) {
    %c0_i32 = arith.constant 0 : i32
    %c0_i32_0 = arith.constant 0 : i32
    return %c0_i32, %arg0 : i32, i32
  }
  func.func @transform_3(%arg0: i32) -> (i32, i32) {
    %c0_i32 = arith.constant 0 : i32
    %c0_i32_0 = arith.constant 0 : i32
    %c0_i32_1 = arith.constant 0 : i32
    return %c0_i32, %c0_i32_0 : i32, i32
  }
  func.func @transform_4(%arg0: i32) -> (i32, i32) {
    %c0_i32 = arith.constant 0 : i32
    %c0_i32_0 = arith.constant 0 : i32
    %c0_i32_1 = arith.constant 0 : i32
    return %c0_i32, %c0_i32_0 : i32, i32
  }
  func.func @transform_5(%arg0: i32) -> (i32, i32) {
    %c0_i32 = arith.constant 0 : i32
    %c0_i32_0 = arith.constant 0 : i32
    %c0_i32_1 = arith.constant 0 : i32
    return %c0_i32, %c0_i32_0 : i32, i32
  }
  func.func @transform_6(%arg0: i32) -> (i32, i32) {
    %c0_i32 = arith.constant 0 : i32
    %c0_i32_0 = arith.constant 0 : i32
    %c0_i32_1 = arith.constant 0 : i32
    return %c0_i32, %c0_i32_0 : i32, i32
  }
  func.func @transform_7(%arg0: i32) -> (i32, i32) {
    %c0_i32 = arith.constant 0 : i32
    %c0_i32_0 = arith.constant 0 : i32
    %c0_i32_1 = arith.constant 0 : i32
    return %c0_i32, %c0_i32_0 : i32, i32
  }
  func.func @transform_8(%arg0: i32) -> (i32, i32) {
    %c0_i32 = arith.constant 0 : i32
    %c0_i32_0 = arith.constant 0 : i32
    %c0_i32_1 = arith.constant 0 : i32
    return %c0_i32, %c0_i32_0 : i32, i32
  }
  func.func @transform_9(%arg0: i32) -> (i32, i32) {
    %c0_i32 = arith.constant 0 : i32
    %c0_i32_0 = arith.constant 0 : i32
    %c0_i32_1 = arith.constant 0 : i32
    return %c0_i32, %c0_i32_0 : i32, i32
  }
  func.func @transform_10(%arg0: i32) -> (i32, i32) {
    %c0_i32 = arith.constant 0 : i32
    %c0_i32_0 = arith.constant 0 : i32
    %c0_i32_1 = arith.constant 0 : i32
    return %c0_i32, %c0_i32_0 : i32, i32
  }
  func.func @transform_11(%arg0: i32) -> (i32, i32) {
    %c0_i32 = arith.constant 0 : i32
    %c0_i32_0 = arith.constant 0 : i32
    %c0_i32_1 = arith.constant 0 : i32
    return %c0_i32, %c0_i32_0 : i32, i32
  }
}

</mosaic_0001>

<bundles_post_ra>
// kernel: tpu_custom_call.1
= control target key start
LH: loop header
LB: loop body
LE: loop exit
PB: predicated region body
PF: predicated region fallthrough
CT: control target
= control target key end

     0   :  { %16 = vsyncpa [#allocation5], 0  ;;  %s1750_s17 = smov 0   ;;  %s1982_s0 = inlined_call_operand.vmem [shape: bf16[384,3], index: 0, kind: input, shape index: {}]   ;;  %s1983_s1 = inlined_call_operand.vmem [shape: s32[384,1], index: 1, kind: input, shape index: {}]   ;;  %s1984_s2 = inlined_call_operand.vmem [shape: s32[1,384], index: 2, kind: input, shape index: {}]   ;;  %s1985_s3 = inlined_call_operand.vmem [shape: bf16[32,4], index: 3, kind: input, shape index: {}]   ;;  %s1986_s4 = inlined_call_operand.vmem [shape: s32[1,32], index: 4, kind: input, shape index: {}]   ;;  %s1987_s5 = inlined_call_operand.vmem [shape: bf16[4,128], index: 5, kind: input, shape index: {}]   ;;  %s1988_s6 = inlined_call_operand.vmem [shape: bf16[3,128], index: 6, kind: input, shape index: {}]   ;;  %s1989_s7 = inlined_call_operand.vmem [shape: f32[1,128], index: 7, kind: input, shape index: {}]   ;;  %s1990_s8 = inlined_call_operand.vmem [shape: f32[4,128], index: 8, kind: input, shape index: {}]   ;;  %s1991_s9 = inlined_call_operand.vmem [shape: f32[128,128], index: 9, kind: input, shape index: {}]   ;;  %s1992_s10 = inlined_call_operand.vmem [shape: f32[1,128], index: 10, kind: input, shape index: {}]   ;;  %s1993_s11 = inlined_call_operand.hbm [shape: f32[3,128], index: 11, kind: output, shape index: {}]  }
   0x1 LB: > { %s1756_s18 = sadd.s32 4294967295, %s1678_s17   ;;  %p1330_p0 = scmp.ge.s32.totalorder %s1678_s17, 1  ;;  %s1678_s17 = sphi %s1750_s17, %s22_s17  }
   0x2   : > { %p353_p1 = scmp.lt.s32.totalorder %s1678_s17, 4 }
   0x4   : > { %p354_p2 = pnand %p1330_p0, %p353_p1 }
   0x5   : > { %s1331_s19 = sshll.u32 (!%p354_p2), %s1756_s18, 4  ;;  %p408_p3 = scmp.lt.s32.totalorder (!%p354_p2), %s1756_s18, 2 }
   0x6   : > { %357 = sbr.rel (%p354_p2) target bundleno = 1093 (0x445), region = 64  ;;  %p397_p4 = scmp.lt.s32.totalorder (!%p354_p2), %s1331_s19, 47 }
   0x7   : > { %p1335_p5 = scmp.ne.s32.totalorder (!%p354_p2), %s1756_s18, 0 }
   0xd   : > { %s1763_s20 = scalar_select %p408_p3, %s1756_s18, 2 }
   0xe   : > { %s1995_s19 = smov (!%p397_p4, %s1331_s19), 47  ;;  %415 = sbr.rel (%p1335_p5) target bundleno = 238 (0xee), region = 68 }
   0xf   : > { %s410_s23 = scalar_lea.vmem %s1984_s2, %s1763_s20  ;;  %s1332_s24 = sshll.u32 %s1995_s19, 2  ;;  %v421_v0 = vld [vmem:[%s1987_s5] sm:$0x3] (!%p1335_p5)  ;;  %vm439_vm0 = vcmask (!%p1335_p5), 1041408   ;;  %v1680_v1 = vmov (!%p1335_p5), 0.0   ;;  %vm432_vm1 = vcmask (!%p1335_p5), 31744  }
  0x10   : > { %s1334_s25 = sshll.u32 %s1995_s19, 3  ;;  %s1772_s28 = scalar_lea.vmem %s1982_s0, %s1332_s24  ;;  %416 = vst [vmem:[#allocation2] sm:$0x7] (!%p1335_p5), %v1680_v1  ;;  %1603 = vmatprep.subr.msk.bf16.mxu0 (!%p1335_p5), %vm439_vm0, %v421_v0  ;;  %v441_v2 = vsel (!%p1335_p5), %vm439_vm0, %v421_v0, 0  ;;  %v1628_v3 = vld [vmem:[%s1985_s3] sm:$0xff] (!%p1335_p5)   ;;  %v1629_v4 = vld [vmem:[%s1985_s3 + $0x8] sm:$0xff] (!%p1335_p5)  }
  0x11   : > { %s1777_s12 = scalar_lea.vmem %s1983_s1, %s1334_s25  ;;  %1452 = vmatpush3.bf16.msra.mxu0 (!%p1335_p5), %v441_v2  ;;  %1453 = vmatprep.mubr.msk.bf16.mxu0 (!%p1335_p5), %vm432_vm1, %v1628_v3 }
  0x14   : > { %1454 = vmatmul.mubr.msk.bf16.vlgmr.msra.gmra.mrb[0].mxu0 (!%p1335_p5), %vm432_vm1, %v1629_v4 }
  0xe7   : > { %v1455_v5 = vpop.f32.mrb[0].mxu0 }
  0xe8   : > { %v477_v6 = vpop.f32.mrb[1].mxu0 }
  0xe9   : > { %v1456_v7 = vpop.f32.mrb[2].mxu0 }
  0xea   : > { %v493_v8 = vpack.c.bf16 %v1456_v7, %v1455_v5  ;;  %v480_v9 = vpop.f32.mrb[3].mxu0 }
  0xeb   : > { %v492_v10 = vpack.c.bf16 %v480_v9, %v477_v6 }
  0xec   : > { %495 = vst [vmem:[#allocation3 + $0x8] sm:$0xff] %v493_v8 }
  0xed   : > { %494 = vst [vmem:[#allocation3] sm:$0xff] %v492_v10 }
  0xee PF: > { %v498_v11 = vld [vmem:[%s1777_s12 + $0x10] sm:$0xff]  ;;  %v496_v12 = vld [vmem:[%s1777_s12] sm:$0xff]  ;;  %vm703_vm2 = vcmask 1040384   ;;  %v1681_v13 = vmov 0   ;;  %vm704_vm3 = vcmask 1041408   ;;  %v1682_v14 = vmov 65535  }
  0xef   : > { %1631 = vset.pattern.permute.xlu1 %v1681_v13  ;;  %1630 = vset.pattern.permute.xlu0 %v1681_v13  ;;  %v705_v15 = vsel %vm703_vm2, 4294967295, %v1682_v14  ;;  %v499_v16 = vld [vmem:[%s1777_s12 + $0x18] sm:$0xff]  ;;  %v497_v17 = vld [vmem:[%s1777_s12 + $0x8] sm:$0xff]  ;;  %v500_v20 = vld [vmem:[%s1777_s12 + $0x20] sm:$0xff]  ;;  %vm678_vm4 = vcmask 23552   ;;  %v1683_v29 = vmov 0.0   ;;  %v513_v44 = vlaneseq }
  0xf0   : > { %522 = vperm.xlu1 %1631, %v498_v11   ;;  %516 = vperm.xlu0 %1630, %v496_v12   ;;  %v706_v18 = vsel %vm704_vm3, %v705_v15, 0  ;;  %v501_v19 = vld [vmem:[%s1777_s12 + $0x28] sm:$0xff]  ;;  %v637_v22 = vld [vmem:[%s1988_s6] sm:$0x3]  ;;  %v503_v27 = vld [vmem:[%s1777_s12 + $0x38] sm:$0xff]  ;;  %vm807_vm9 = vcmask 261120  }
  0xf1   : > { %v708_v23 = vand.u32 %v706_v18, %v637_v22  ;;  %v1632_v24 = vld [vmem:[%s1772_s28] sm:$0xff]   ;;  %v1633_v26 = vld [vmem:[%s1772_s28 + $0x8] sm:$0xff]   ;;  %v502_v28 = vld [vmem:[%s1777_s12 + $0x30] sm:$0xff]  ;;  %v1826_v45 = vand.u32 127, %v513_v44  ;;  %p1385_p6 = scmp.ne.s32.totalorder %s1756_s18, 2 }
  0xf2   : > { %1459 = vmatprep.mubr.msk.bf16.mxu1 %vm678_vm4, %v1632_v24  ;;  %v1634_v30 = vld [vmem:[%s1772_s28 + $0x10] sm:$0xff]   ;;  %v505_v31 = vld [vmem:[%s1777_s12 + $0x48] sm:$0xff]  ;;  %v504_v32 = vld [vmem:[%s1777_s12 + $0x40] sm:$0xff] }
  0xf3   : > { %v620_v25 = vld [vmem:[#allocation3 + $0x8] sm:$0xff]  ;;  %1457 = vmatprep.subr.bf16.mxu1 %v708_v23  ;;  %v1635_v33 = vld [vmem:[%s1772_s28 + $0x18] sm:$0xff]   ;;  %v1636_v36 = vld [vmem:[%s1772_s28 + $0x20] sm:$0xff]  }
  0xf4   : > { %v619_v21 = vld [vmem:[#allocation3] sm:$0xff]  ;;  %525 = vperm.xlu1 %1631, %v499_v16   ;;  %519 = vperm.xlu0 %1630, %v497_v17   ;;  %v507_v34 = vld [vmem:[%s1777_s12 + $0x58] sm:$0xff]  ;;  %v506_v35 = vld [vmem:[%s1777_s12 + $0x50] sm:$0xff] }
  0xf5   : > { %1475 = vmatprep.subr.bf16.mxu0 %v619_v21  ;;  %1458 = vmatpush3.bf16.msra.mxu1 %v708_v23  ;;  %v509_v37 = vld [vmem:[%s1777_s12 + $0x68] sm:$0xff]  ;;  %v508_v38 = vld [vmem:[%s1777_s12 + $0x60] sm:$0xff]  ;;  %v511_v40 = vld [vmem:[%s1777_s12 + $0x78] sm:$0xff] }
  0xf6   : > { %1476 = vmatpush3.bf16.msra.mxu0 %v619_v21  ;;  %1495 = vmatprep.subr.bf16.mxu1 %v1683_v29  ;;  %v1637_v39 = vld [vmem:[%s1772_s28 + $0x28] sm:$0xff]   ;;  %v510_v41 = vld [vmem:[%s1777_s12 + $0x70] sm:$0xff]  ;;  %v1639_v43 = vld [vmem:[%s1772_s28 + $0x38] sm:$0xff]  }
  0xf7   : > { %1477 = vmatprep.subr.bf16.mxu0 %v620_v25  ;;  %v1638_v42 = vld [vmem:[%s1772_s28 + $0x30] sm:$0xff]  }
  0xf8   : > { %531 = vperm.xlu1 %1631, %v501_v19   ;;  %528 = vperm.xlu0 %1630, %v500_v20  }
  0xf9   : > { %1460 = vmatmul.mubr.msk.bf16.vlgmr.msra.gmra.mrb[0].mxu1 %vm678_vm4, %v1633_v26 }
  0xfa   : > { %1478 = vmatpush3.bf16.msra.mxu0 %v620_v25  ;;  %1463 = vmatprep.mubr.msk.bf16.mxu1 %vm678_vm4, %v1634_v30 }
  0xfc   : > { %537 = vperm.xlu1 %1631, %v503_v27   ;;  %534 = vperm.xlu0 %1630, %v502_v28  }
 0x100   : > { %543 = vperm.xlu1 %1631, %v505_v31   ;;  %540 = vperm.xlu0 %1630, %v504_v32  }
 0x101   : > { %1464 = vmatmul.mubr.msk.bf16.gmra.mrb[4].mxu1 %vm678_vm4, %v1635_v33 }
 0x102   : > { %1467 = vmatprep.mubr.msk.bf16.mxu1 %vm678_vm4, %v1636_v36 }
 0x104   : > { %549 = vperm.xlu1 %1631, %v507_v34   ;;  %546 = vperm.xlu0 %1630, %v506_v35  }
 0x108   : > { %555 = vperm.xlu1 %1631, %v509_v37   ;;  %552 = vperm.xlu0 %1630, %v508_v38  }
 0x109   : > { %1468 = vmatmul.mubr.msk.bf16.gmra.mrb[8].mxu1 %vm678_vm4, %v1637_v39 }
 0x10a   : > { %1471 = vmatprep.mubr.msk.bf16.mxu1 %vm678_vm4, %v1638_v42  ;;  %v1380_v42 = vld [vmem:[%s1989_s7] ss:$0 sm:$0xff] }
 0x10c   : > { %561 = vperm.xlu1 %1631, %v511_v40   ;;  %558 = vperm.xlu0 %1630, %v510_v41  }
 0x111   : > { %1472 = vmatmul.mubr.msk.bf16.gmra.mrb[12].mxu1 %vm678_vm4, %v1639_v43 }
 0x16f   : > { %v523_v46 = vpop.permute.xlu1 %522  ;;  %v517_v47 = vpop.permute.xlu0 %516 }
 0x170   : > { %vm565_vm5 = vcmp.eq.s32.totalorder %v1826_v45, %v523_v46  ;;  %vm563_vm6 = vcmp.eq.s32.totalorder %v1826_v45, %v517_v47 }
 0x171   : > { %v1342_v50 = vsel %vm565_vm5, 1.0, %v1683_v29  ;;  %v1340_v51 = vsel %vm563_vm6, 1.0, %v1683_v29  ;;  %vm1684_vm6 = vmmov 0  }
 0x172   : > { %1511 = vmatprep.mubr.msk.bf16.mxu1 %vm1684_vm6, %v1683_v29 }
 0x173   : > { %v526_v48 = vpop.permute.xlu1 %525  ;;  %v520_v49 = vpop.permute.xlu0 %519 }
 0x174   : > { %vm566_vm7 = vcmp.eq.s32.totalorder %v1826_v45, %v526_v48  ;;  %vm564_vm8 = vcmp.eq.s32.totalorder %v1826_v45, %v520_v49 }
 0x175   : > { %v1343_v52 = vsel %vm566_vm7, 1.0, %v1683_v29  ;;  %v1341_v53 = vsel %vm564_vm8, 1.0, %v1683_v29 }
 0x176   : > { %v612_v54 = vpack.c.bf16 %v1343_v52, %v1342_v50  ;;  %v611_v55 = vpack.c.bf16 %v1341_v53, %v1340_v51 }
 0x177   : > { %v532_v56 = vpop.permute.xlu1 %531  ;;  %v529_v57 = vpop.permute.xlu0 %528 }
 0x178   : > { %vm568_vm10 = vcmp.eq.s32.totalorder %v1826_v45, %v532_v56  ;;  %vm567_vm11 = vcmp.eq.s32.totalorder %v1826_v45, %v529_v57  ;;  %1479 = vmatprep.mubr.msk.bf16.mxu0 %vm807_vm9, %v611_v55 }
 0x179   : > { %v1345_v58 = vsel %vm568_vm10, 1.0, %v1683_v29  ;;  %v1344_v59 = vsel %vm567_vm11, 1.0, %v1683_v29  ;;  %1480 = vmatmul.mubr.msk.bf16.vlgmr.msra.gmra.mrb[0].mxu0 %vm807_vm9, %v612_v54  ;;  %vm1687_vm10 = vmmov (!%p1385_p6), 0  }
 0x17a   : > { %v613_v60 = vpack.c.bf16 %v1345_v58, %v1344_v59 }
 0x17b   : > { %v538_v61 = vpop.permute.xlu1 %537  ;;  %v535_v62 = vpop.permute.xlu0 %534 }
 0x17c   : > { %vm570_vm12 = vcmp.eq.s32.totalorder %v1826_v45, %v538_v61  ;;  %vm569_vm13 = vcmp.eq.s32.totalorder %v1826_v45, %v535_v62  ;;  %1483 = vmatprep.mubr.msk.bf16.mxu0 %vm807_vm9, %v613_v60 }
 0x17d   : > { %v1347_v63 = vsel %vm570_vm12, 1.0, %v1683_v29  ;;  %v1346_v0 = vsel %vm569_vm13, 1.0, %v1683_v29  ;;  %vm1177_vm12 = vcmask (!%p1385_p6), 1043456  }
 0x17e   : > { %v614_v1 = vpack.c.bf16 %v1347_v63, %v1346_v0 }
 0x17f   : > { %v544_v2 = vpop.permute.xlu1 %543  ;;  %v541_v3 = vpop.permute.xlu0 %540 }
 0x180   : > { %vm572_vm14 = vcmp.eq.s32.totalorder %v1826_v45, %v544_v2  ;;  %vm571_vm15 = vcmp.eq.s32.totalorder %v1826_v45, %v541_v3 }
 0x181   : > { %v1349_v4 = vsel %vm572_vm14, 1.0, %v1683_v29  ;;  %v1348_v5 = vsel %vm571_vm15, 1.0, %v1683_v29  ;;  %1484 = vmatmul.mubr.msk.bf16.gmra.mrb[4].mxu0 %vm807_vm9, %v614_v1 }
 0x182   : > { %v615_v6 = vpack.c.bf16 %v1349_v4, %v1348_v5 }
 0x183   : > { %v550_v7 = vpop.permute.xlu1 %549  ;;  %v547_v8 = vpop.permute.xlu0 %546 }
 0x184   : > { %vm574_vm0 = vcmp.eq.s32.totalorder %v1826_v45, %v550_v7  ;;  %vm573_vm1 = vcmp.eq.s32.totalorder %v1826_v45, %v547_v8  ;;  %1487 = vmatprep.mubr.msk.bf16.mxu0 %vm807_vm9, %v615_v6 }
 0x185   : > { %v1351_v9 = vsel %vm574_vm0, 1.0, %v1683_v29  ;;  %v1350_v10 = vsel %vm573_vm1, 1.0, %v1683_v29 }
 0x186   : > { %v616_v11 = vpack.c.bf16 %v1351_v9, %v1350_v10 }
 0x187   : > { %v556_v12 = vpop.permute.xlu1 %555  ;;  %v553_v13 = vpop.permute.xlu0 %552 }
 0x188   : > { %vm576_vm2 = vcmp.eq.s32.totalorder %v1826_v45, %v556_v12  ;;  %vm575_vm3 = vcmp.eq.s32.totalorder %v1826_v45, %v553_v13 }
 0x189   : > { %v1353_v14 = vsel %vm576_vm2, 1.0, %v1683_v29  ;;  %v1352_v15 = vsel %vm575_vm3, 1.0, %v1683_v29  ;;  %1488 = vmatmul.mubr.msk.bf16.gmra.mrb[8].mxu0 %vm807_vm9, %v616_v11 }
 0x18a   : > { %v617_v16 = vpack.c.bf16 %v1353_v14, %v1352_v15 }
 0x18b   : > { %v562_v17 = vpop.permute.xlu1 %561  ;;  %v559_v18 = vpop.permute.xlu0 %558 }
 0x18c   : > { %vm578_vm4 = vcmp.eq.s32.totalorder %v1826_v45, %v562_v17  ;;  %vm577_vm5 = vcmp.eq.s32.totalorder %v1826_v45, %v559_v18  ;;  %1491 = vmatprep.mubr.msk.bf16.mxu0 %vm807_vm9, %v617_v16 }
 0x18d   : > { %v1355_v19 = vsel %vm578_vm4, 1.0, %v1683_v29  ;;  %v1354_v20 = vsel %vm577_vm5, 1.0, %v1683_v29 }
 0x18e   : > { %v618_v21 = vpack.c.bf16 %v1355_v19, %v1354_v20 }
 0x191   : > { %1492 = vmatmul.mubr.msk.bf16.gmra.mrb[12].mxu0 %vm807_vm9, %v618_v21 }
 0x1cc   : > { %v1461_v22 = vpop.f32.mrb[0].mxu1 }
 0x1cd   : > { %v744_v23 = vpop.f32.mrb[1].mxu1 }
 0x1ce   : > { %v1462_v24 = vpop.f32.mrb[2].mxu1 }
 0x1cf   : > { %v747_v25 = vpop.f32.mrb[3].mxu1 }
 0x1d4   : > { %v1465_v26 = vpop.f32.mrb[4].mxu1 }
 0x1d5   : > { %v760_v27 = vpop.f32.mrb[5].mxu1 }
 0x1d6   : > { %v1466_v28 = vpop.f32.mrb[6].mxu1 }
 0x1d7   : > { %v763_v30 = vpop.f32.mrb[7].mxu1 }
 0x1dc   : > { %v1469_v31 = vpop.f32.mrb[8].mxu1 }
 0x1dd   : > { %v776_v32 = vpop.f32.mrb[9].mxu1 }
 0x1de   : > { %v1470_v33 = vpop.f32.mrb[10].mxu1 }
 0x1df   : > { %v779_v34 = vpop.f32.mrb[11].mxu1 }
 0x1e4   : > { %v1473_v35 = vpop.f32.mrb[12].mxu1 }
 0x1e5   : > { %v792_v36 = vpop.f32.mrb[13].mxu1 }
 0x1e6   : > { %v1474_v37 = vpop.f32.mrb[14].mxu1 }
 0x1e7   : > { %v1868_v38 = vpop.f32.mrb[15].mxu1 }
 0x24c   : > { %v1481_v39 = vpop.f32.mrb[0].mxu0 }
 0x24d   : > { %v875_v40 = vadd.f32 %v1481_v39, %v1461_v22  ;;  %v866_v41 = vpop.f32.mrb[1].mxu0 }
 0x24e   : > { %v867_v43 = vadd.f32 %v866_v41, %v744_v23  ;;  %v1482_v45 = vpop.f32.mrb[2].mxu0 }
 0x24f   : > { %v878_v46 = vadd.f32 %v1482_v45, %v1462_v24  ;;  %v869_v47 = vpop.f32.mrb[3].mxu0  ;;  %v938_v49 = vadd.f32 %v1380_v42, %v875_v40  ;;  %v1386_v45 = vld [vmem:[%s1986_s4] ss:$0 sm:$0xff] (!%p1385_p6) }
 0x250   : > { %v870_v48 = vadd.f32 %v869_v47, %v747_v25  ;;  %v936_v51 = vadd.f32 %v1380_v42, %v867_v43  ;;  %v1641_v43 = vld [vmem:[%s1985_s3 + $0x8] sm:$0xff] (!%p1385_p6)  }
 0x251   : > { %v939_v50 = vadd.f32 %v1380_v42, %v878_v46  ;;  %v1087_v46 = vld [vmem:[%s1991_s9] sm:$0xff] (!%p1385_p6)  ;;  %v1088_v47 = vld [vmem:[%s1991_s9 + $0x8] sm:$0xff] (!%p1385_p6) }
 0x252   : > { %v937_v52 = vadd.f32 %v1380_v42, %v870_v48  ;;  %v1688_v48 = vmov (!%p1385_p6), 0.0|0.0  }
 0x253   : > { %v964_v53 = vpack.c.bf16 %v939_v50, %v938_v49  ;;  %v1564_v49 = vpack.c.bf16 (!%p1385_p6), %v1088_v47, %v1087_v46  ;;  %v1089_v50 = vld [vmem:[%s1991_s9 + $0x10] sm:$0xff] (!%p1385_p6) }
 0x254   : > { %v963_v54 = vpack.c.bf16 %v937_v52, %v936_v51  ;;  %v1485_v55 = vpop.f32.mrb[4].mxu0  ;;  %v1090_v51 = vld [vmem:[%s1991_s9 + $0x18] sm:$0xff] (!%p1385_p6) }
 0x255   : > { %v891_v56 = vadd.f32 %v1485_v55, %v1465_v26  ;;  %v882_v57 = vpop.f32.mrb[5].mxu0  ;;  %v1091_v55 = vld [vmem:[%s1991_s9 + $0x20] sm:$0xff] (!%p1385_p6) }
 0x256   : > { %v883_v58 = vadd.f32 %v882_v57, %v760_v27  ;;  %v1486_v59 = vpop.f32.mrb[6].mxu0  ;;  %1496 = vmatpush3.bf16.msra.mxu1 %v963_v54  ;;  %v1567_v54 = vpack.c.bf16 (!%p1385_p6), %v1090_v51, %v1089_v50  ;;  %v1085_v57 = vld [vmem:[%s1990_s8] sm:$0xf] (!%p1385_p6) }
 0x257   : > { %v894_v60 = vadd.f32 %v1486_v59, %v1466_v28  ;;  %v885_v61 = vpop.f32.mrb[7].mxu0  ;;  %1497 = vmatprep.subr.bf16.mxu1 %v1683_v29  ;;  %v942_v63 = vadd.f32 %v1380_v42, %v891_v56  ;;  %v1092_v56 = vld [vmem:[%s1991_s9 + $0x28] sm:$0xff] (!%p1385_p6)  ;;  %v1093_v59 = vld [vmem:[%s1991_s9 + $0x30] sm:$0xff] (!%p1385_p6) }
 0x258   : > { %v886_v62 = vadd.f32 %v885_v61, %v763_v30  ;;  %v940_v1 = vadd.f32 %v1380_v42, %v883_v58  ;;  %v1570_v58 = vpack.c.bf16 (!%p1385_p6), %v1092_v56, %v1091_v55 }
 0x259   : > { %v943_v0 = vadd.f32 %v1380_v42, %v894_v60  ;;  %v1094_v60 = vld [vmem:[%s1991_s9 + $0x38] sm:$0xff] (!%p1385_p6) }
 0x25a   : > { %v941_v2 = vadd.f32 %v1380_v42, %v886_v62  ;;  %1498 = vmatpush3.bf16.msra.mxu1 %v964_v53  ;;  %v1573_v61 = vpack.c.bf16 (!%p1385_p6), %v1094_v60, %v1093_v59  ;;  %v1095_v62 = vld [vmem:[%s1991_s9 + $0x40] sm:$0xff] (!%p1385_p6) }
 0x25b   : > { %v966_v3 = vpack.c.bf16 %v943_v0, %v942_v63  ;;  %1499 = vmatprep.subr.bf16.mxu1 %v1683_v29  ;;  %v1096_v63 = vld [vmem:[%s1991_s9 + $0x48] sm:$0xff] (!%p1385_p6) }
 0x25c   : > { %v965_v4 = vpack.c.bf16 %v941_v2, %v940_v1  ;;  %v1489_v5 = vpop.f32.mrb[8].mxu0  ;;  %v1576_v0 = vpack.c.bf16 (!%p1385_p6), %v1096_v63, %v1095_v62  ;;  %v1097_v1 = vld [vmem:[%s1991_s9 + $0x50] sm:$0xff] (!%p1385_p6)  ;;  %v1098_v2 = vld [vmem:[%s1991_s9 + $0x58] sm:$0xff] (!%p1385_p6) }
 0x25d   : > { %v907_v6 = vadd.f32 %v1489_v5, %v1469_v31  ;;  %v898_v7 = vpop.f32.mrb[9].mxu0  ;;  %v1100_v5 = vld [vmem:[%s1991_s9 + $0x68] sm:$0xff] (!%p1385_p6) }
 0x25e   : > { %v899_v8 = vadd.f32 %v898_v7, %v776_v32  ;;  %v1490_v9 = vpop.f32.mrb[10].mxu0  ;;  %1500 = vmatpush3.bf16.msra.mxu1 %v965_v4  ;;  %v1099_v4 = vld [vmem:[%s1991_s9 + $0x60] sm:$0xff] (!%p1385_p6)  ;;  %v1101_v7 = vld [vmem:[%s1991_s9 + $0x70] sm:$0xff] (!%p1385_p6) }
 0x25f   : > { %v910_v10 = vadd.f32 %v1490_v9, %v1470_v33  ;;  %v901_v11 = vpop.f32.mrb[11].mxu0  ;;  %1501 = vmatprep.subr.bf16.mxu1 %v1683_v29  ;;  %v946_v13 = vadd.f32 %v1380_v42, %v907_v6  ;;  %v953_v33 = vshrl.u32 %v513_v44, 7  ;;  %v1582_v6 = vpack.c.bf16 (!%p1385_p6), %v1100_v5, %v1099_v4 }
 0x260   : > { %v902_v12 = vadd.f32 %v901_v11, %v779_v34  ;;  %v944_v15 = vadd.f32 %v1380_v42, %v899_v8  ;;  %v1102_v8 = vld [vmem:[%s1991_s9 + $0x78] sm:$0xff] (!%p1385_p6) }
 0x261   : > { %v947_v14 = vadd.f32 %v1380_v42, %v910_v10  ;;  %vm1022_vm11 = vcmp.eq.s32.totalorder (!%p1385_p6), %v953_v33, %v1386_v45  ;;  %v1585_v9 = vpack.c.bf16 (!%p1385_p6), %v1102_v8, %v1101_v7 }
 0x262   : > { %v945_v16 = vadd.f32 %v1380_v42, %v902_v12  ;;  %1502 = vmatpush3.bf16.msra.mxu1 %v966_v3  ;;  %v1579_v3 = vpack.c.bf16 (!%p1385_p6), %v1098_v2, %v1097_v1 }
 0x263   : > { %v968_v17 = vpack.c.bf16 %v947_v14, %v946_v13  ;;  %1503 = vmatprep.subr.bf16.mxu1 %v1683_v29 }
 0x264   : > { %v967_v18 = vpack.c.bf16 %v945_v16, %v944_v15  ;;  %v1493_v19 = vpop.f32.mrb[12].mxu0 }
 0x265   : > { %v923_v20 = vadd.f32 %v1493_v19, %v1473_v35  ;;  %v914_v21 = vpop.f32.mrb[13].mxu0  ;;  %v1381_v35 = vld [vmem:[%s410_s23] ss:$0 sm:$0xff] }
 0x266   : > { %v915_v22 = vadd.f32 %v914_v21, %v792_v36  ;;  %v1494_v23 = vpop.f32.mrb[14].mxu0  ;;  %1504 = vmatpush3.bf16.msra.mxu1 %v967_v18  ;;  %vm958_vm7 = vcmp.eq.s32.totalorder %v953_v33, %v1381_v35  ;;  %v1685_v36 = vmov 1.0|1.0   ;;  %v1393_v18 = vld [vmem:[%s1992_s10] ss:$0 sm:$0xff] (!%p1385_p6) }
 0x267   : > { %v926_v24 = vadd.f32 %v1494_v23, %v1474_v37  ;;  %v917_v25 = vpop.f32.mrb[15].mxu0  ;;  %1505 = vmatprep.subr.bf16.mxu1 %v1683_v29  ;;  %v950_v27 = vadd.f32 %v1380_v42, %v923_v20  ;;  %vm1383_vm8 = vmpackc.low %vm958_vm7, %vm958_vm7  ;;  %v962_v37 = vld [vmem:[#allocation2] sm:$0x7] }
 0x268   : > { %v918_v26 = vadd.f32 %v917_v25, %v1868_v38  ;;  %v948_v30 = vadd.f32 %v1380_v42, %v915_v22 }
 0x269   : > { %v951_v28 = vadd.f32 %v1380_v42, %v926_v24 }
 0x26a   : > { %v949_v31 = vadd.f32 %v1380_v42, %v918_v26  ;;  %1506 = vmatpush3.bf16.msra.mxu1 %v968_v17  ;;  %v1640_v42 = vld [vmem:[%s1985_s3] sm:$0xff] (!%p1385_p6)  }
 0x26b   : > { %v970_v32 = vpack.c.bf16 %v951_v28, %v950_v27  ;;  %1507 = vmatprep.subr.bf16.mxu1 %v1683_v29 }
 0x26c   : > { %v969_v34 = vpack.c.bf16 %v949_v31, %v948_v30 }
 0x26e   : > { %1508 = vmatpush3.bf16.msra.mxu1 %v969_v34 }
 0x26f   : > { %1509 = vmatprep.subr.bf16.mxu1 %v1683_v29  ;;  %v1686_v29 = vmov (!%p1385_p6), 0.0  }
 0x270   : > { %1515 = vmatprep.subr.bf16.mxu0 (!%p1385_p6), %v1686_v29  ;;  %1519 = vmatprep.mubr.msk.bf16.mxu0 (!%p1385_p6), %vm1687_vm10, %v1686_v29  ;;  %v1387_v52 = vsel (!%p1385_p6), %vm1022_vm11, 1.0, %v1686_v29 }
 0x271   : > { %1516 = vmatpush3.bf16.msra.mxu0 (!%p1385_p6), %v1640_v42  ;;  %v1025_v53 = vpack.c.bf16 (!%p1385_p6), %v1387_v52, %v1387_v52 }
 0x272   : > { %1510 = vmatpush3.bf16.msra.mxu1 %v970_v32  ;;  %1517 = vmatprep.subr.bf16.mxu0 (!%p1385_p6), %v1686_v29 }
 0x273   : > { %1563 = vmatprep.subr.bf16.mxu1 (!%p1385_p6), %v1688_v48 }
 0x275   : > { %1512 = vmatmul.mubr.msk.bf16.vlgmr.msra.gmra.mrb[16].mxu1 %vm1383_vm8, %v1685_v36  ;;  %1518 = vmatpush3.bf16.msra.mxu0 (!%p1385_p6), %v1641_v43 }
 0x276   : > { %1555 = vmatprep.mubr.msk.f32.mxu1 (!%p1385_p6), %vm1687_vm10, %v1686_v29  ;;  %1565 = vmatpush3.bf16.msra.mxu1 (!%p1385_p6), %v1564_v49 }
 0x277   : > { %1566 = vmatprep.subr.bf16.mxu1 (!%p1385_p6), %v1688_v48  ;;  %1558 = vmatprep.subr.mxu0 (!%p1385_p6), %v1686_v29 }
 0x278   : > { %1520 = vmatmul.mubr.msk.bf16.vlgmr.msra.gmra.mrb[0].mxu0 (!%p1385_p6), %vm807_vm9, %v1025_v53  ;;  %vm1173_vm9 = vcmask (!%p1385_p6), 31744  }
 0x279   : > { %1559 = vmatpush3.msk.msra.mxu0 (!%p1385_p6), %vm1177_vm12, %v1085_v57  ;;  %1560 = vmatprep.mubr.msk.f32.mxu0 (!%p1385_p6), %vm1687_vm10, %v1686_v29 }
 0x27a   : > { %1568 = vmatpush3.bf16.msra.mxu1 (!%p1385_p6), %v1567_v54 }
 0x27b   : > { %1569 = vmatprep.subr.bf16.mxu1 (!%p1385_p6), %v1688_v48 }
 0x27e   : > { %1571 = vmatpush3.bf16.msra.mxu1 (!%p1385_p6), %v1570_v58 }
 0x27f   : > { %1572 = vmatprep.subr.bf16.mxu1 (!%p1385_p6), %v1688_v48 }
 0x282   : > { %1574 = vmatpush3.bf16.msra.mxu1 (!%p1385_p6), %v1573_v61 }
 0x283   : > { %1575 = vmatprep.subr.bf16.mxu1 (!%p1385_p6), %v1688_v48 }
 0x286   : > { %1577 = vmatpush3.bf16.msra.mxu1 (!%p1385_p6), %v1576_v0 }
 0x287   : > { %1578 = vmatprep.subr.bf16.mxu1 (!%p1385_p6), %v1688_v48 }
 0x28a   : > { %1580 = vmatpush3.bf16.msra.mxu1 (!%p1385_p6), %v1579_v3 }
 0x28b   : > { %1581 = vmatprep.subr.bf16.mxu1 (!%p1385_p6), %v1688_v48 }
 0x28e   : > { %1583 = vmatpush3.bf16.msra.mxu1 (!%p1385_p6), %v1582_v6 }
 0x28f   : > { %1584 = vmatprep.subr.bf16.mxu1 (!%p1385_p6), %v1688_v48 }
 0x292   : > { %1586 = vmatpush3.bf16.msra.mxu1 (!%p1385_p6), %v1585_v9 }
 0x345   : > { %1016 = sbr.rel (%p1385_p6) target bundleno = 1068 (0x42c), region = 72 }
 0x348   : > { %v1005_v38 = vpop.f32.mrb[16].mxu1 }
 0x349   : > { %v1011_v39 = vadd.f32 %v1005_v38, %v962_v37  ;;  %v1513_v40 = vpop.f32.mrb[17].mxu1 }
 0x34a   : > { %v1008_v41 = vpop.f32.mrb[18].mxu1 }
 0x34b   : > { %1012 = vst [vmem:[#allocation2] sm:$0x7] %v1011_v39  ;;  %v1514_v44 = vpop.f32.mrb[19].mxu1  ;;  %v1079_v11 = vpop.f32.mrb[0].mxu0 (!%p1385_p6) }
 0x34c   : > { %v1521_v12 = vpop.f32.mrb[1].mxu0  ;;  %1561 = vmatmul.mubr.msk.f32.vlgmr.msra.gmra.mrb[4].mxu0 %vm1173_vm9, %v1079_v11 }
 0x34d   : > { %v1082_v13 = vpop.f32.mrb[2].mxu0 }
 0x34e   : > { %v1522_v14 = vpop.f32.mrb[3].mxu0 }
 0x352   : > { %v1086_v10 = vld [vmem:[#allocation2] sm:$0x7] }
 0x353   : > { %1556 = vmatmul.mubr.f32.vlgmr.msra.gmra.mrb[0].mxu1 %v1086_v10 }
 0x41f   : > { %v1247_v17 = vpop.f32.mrb[4].mxu0 }
 0x420   : > { %v1562_v20 = vpop.f32.mrb[5].mxu0 }
 0x426   : > { %v1169_v15 = vpop.f32.mrb[0].mxu1 }
 0x427   : > { %v1557_v16 = vpop.f32.mrb[1].mxu1  ;;  %v1248_v19 = vadd.f32 %v1247_v17, %v1169_v15 }
 0x429   : > { %v1258_v21 = vadd.f32 %v1393_v18, %v1248_v19 }
 0x42b   : > { %1259 = vst [vmem:[#allocation4] sm:$0x7] %v1258_v21 }
 0x42c PF: > { %p1608_p7 = scmp.eq.s32.totalorder %s1756_s18, 2  ;;  %s1689_s16 = smov [#allocation4]  }
 0x42d   : > { %s1267_s19 = sshll.u32 %s1689_s16, 4  ;;  %s1268_s19 = int_to_ptr.vmem [resolvable:$true] %s1267_s19 }
 0x42e   : > { %s1642_s21 = scalar_lea.vmem %s1268_s19, 64  ;;  %p1649_p11 = scmp.lt.s32.totalorder %s1268_s19, %s1268_s19 }
 0x42f   : > { %p1643_p8 = scmp.ne.s32.totalorder %s1268_s19, %s1642_s21  ;;  %p1650_p12 = scmp.lt.s32.totalorder %s1642_s21, %s1642_s21 }
 0x431   : > { %p1644_p9 = pnand %p1643_p8, %p1608_p7  ;;  %p1651_p13 = por %p1650_p12, %p1649_p11 }
 0x433   : > { %p1645_p10 = pneg %p1644_p9 }
 0x435   : > { %p1652_p0 = pnand %p1651_p13, %p1645_p10 }
 0x437   : > { %1655 = shalt.err (!%p1652_p0)
}
 0x438   : > { %s1656_s25 = scalar_lea.hbm %s1993_s11, 64 }
 0x439   : > { %p1657_p1 = scmp.ne.s32.totalorder %s1993_s11, %s1656_s25  ;;  %p1662_p4 = scmp.lt.u32.totalorder %s1656_s25, %s1993_s11 }
 0x43b   : > { %p1658_p2 = pnand %p1657_p1, %p1608_p7 }
 0x43d   : > { %p1659_p3 = pneg %p1658_p2 }
 0x43f   : > { %p1664_p5 = pnand %p1662_p4, %p1659_p3 }
 0x441   : > { %1667 = shalt.err (!%p1664_p5)
}
 0x442   : > { %1605 = dma.vmem_to_hbm [thread:$0]  (%p1608_p7), %s1268_s19, 64, %s1993_s11, [#allocation5]  }
 0x443   : > { %1673 = dma.done.wait (%p1608_p7), [#allocation5], 64  }
 0x444   : > { %1675 = vsyncadd (%p1608_p7), [#allocation5], 4294967232 }
 0x445 PF: > { %s22_s17 = sadd.s32 1, %s1678_s17  }
 0x446   : > { %p19_p6 = scmp.ge.s32.totalorder %s22_s17, 5  }
 0x448   :  { %21 = sbr.rel (!%p19_p6) target bundleno = 1 (0x1), region = 105 }
 0x44f   :  { %1280 = vsyncpa [#allocation5], 1 }
 0x450   :  { %1282 = vsyncpa [#allocation5 + $0x1], 1 }

</bundles_post_ra>
